<compile_context>
chip_gen: v5e
topology: v5e:2x2
jax: 0.10.0
libtpu: 0.0.40
codegen_flags: <defaults>
</compile_context>

<pallas_src>
import functools

import jax
import jax.numpy as jnp
from jax.experimental import pallas as pl
from jax.experimental.pallas import tpu as pltpu


def _ce_kernel(pred_ref, lab_ref, out_ref, *, ignore_index, hw, tile_px,
               class_chunk, ragged):
    """Softmax cross entropy for one (image, pixel-tile) grid cell.

    pred_ref: (1, C, T) logits tile (native dtype, f32 or bf16)
    lab_ref : (1, 1, T) integer labels tile
    out_ref : (1, 1, 1, 1) f32 partial loss sum for this tile
    """
    c = pred_ref.shape[1]
    t = pred_ref.shape[2]
    in_dtype = pred_ref.dtype

    lab = lab_ref[0].astype(jnp.int32)                       # (1, T)

    # Class-chunked two-pass log-sum-exp.  Static slice starts -> free Ref
    # views; chunk results fold into (1, T) running accumulators, so the
    # in-kernel VMEM working set is bounded by the chunk size, not C.
    cc = min(class_chunk, c)
    chunk_bounds = [(s, min(cc, c - s)) for s in range(0, c, cc)]

    # Pass 1: running max over classes.  Kept in the input dtype (max is exact
    # in bf16), upcast once to f32 for the exp/log path.
    m = None
    for s, sz in chunk_bounds:
        cm = jnp.max(pred_ref[0, s:s + sz, :], axis=0, keepdims=True)
        m = cm if m is None else jnp.maximum(m, cm)
    m32 = m.astype(jnp.float32)                               # (1, T)

    # Pass 2: sum(exp(x - m)) in f32, and the label-class logit via a one-hot
    # compare.  `picked` stays in the input dtype: exactly one nonzero term
    # per pixel across all chunks, so the bf16 accumulation is exact.
    # Note: labels outside [0, C) other than ignore_index give picked == 0
    # (loss = lse) instead of erroring like F.cross_entropy.
    sumexp = jnp.zeros((1, t), jnp.float32)
    picked = jnp.zeros((1, t), in_dtype)
    zero = jnp.zeros((), in_dtype)
    for s, sz in chunk_bounds:
        blk = pred_ref[0, s:s + sz, :]                        # (sz, T) native
        cls = s + jax.lax.broadcasted_iota(jnp.int32, (sz, t), 0)
        picked = picked + jnp.sum(jnp.where(cls == lab, blk, zero),
                                  axis=0, keepdims=True)
        sumexp = sumexp + jnp.sum(jnp.exp(blk.astype(jnp.float32) - m32),
                                  axis=0, keepdims=True)

    # loss = lse - picked = log(sumexp) + m - picked
    loss = jnp.log(sumexp) + (m32 - picked.astype(jnp.float32))   # (1, T)
    masked = jnp.where(lab != ignore_index, loss, 0.0)

    if not ragged:
        # All tiles are full; no out-of-range lanes to mask.
        out_ref[...] = jnp.sum(masked, axis=1, keepdims=True)[None, None]
    else:
        j = pl.program_id(1)
        is_last = j == pl.num_programs(1) - 1

        @pl.when(is_last)
        def _():
            # Trailing partial tile: zero the lanes past hw.  The padded
            # region may hold garbage/NaN, but select() does not propagate
            # values from the unselected branch on TPU.
            pix = jax.lax.broadcasted_iota(jnp.int32, (1, t), 1)
            in_b = pix < (hw - j * tile_px)
            out_ref[...] = jnp.sum(jnp.where(in_b, masked, 0.0),
                                   axis=1, keepdims=True)[None, None]

        @pl.when(jnp.logical_not(is_last))
        def _():
            out_ref[...] = jnp.sum(masked, axis=1, keepdims=True)[None, None]


def _vmem_capacity_bytes():
    """Per-core physical VMEM queried at trace time, with a safe fallback."""
    get_info = getattr(pltpu, "get_tpu_info", None)
    if get_info is not None:
        try:
            info = get_info()
            for name in ("vmem_capacity_bytes", "vmem_bytes", "vmem_size_bytes"):
                cap = getattr(info, name, None)
                if cap:
                    return int(cap)
        except Exception:
            pass
    return 64 * 1024 * 1024   # smallest physical per-core VMEM (v7x)


def cross_entropy_loss(cls_score, label, *, loss_weight=1.0,
                       ignore_index=-100, tile_px=32768):
    """Pallas implementation of CrossEntropyLoss().forward(cls_score, label).

    cls_score: (N, C, H, W) logits (NCHW, native dtype, e.g. f32 or bf16)
    label    : (N, H, W) int class indices (may contain ignore_index)
    returns  : scalar f32 loss (reduction='mean', scaled by loss_weight)
    """
    N, C, H, W = cls_score.shape
    HW = H * W
    P = N * HW

    # Free (contiguous) reshapes only -- no transpose / upcast / pad in HBM.
    pred = cls_score.reshape(N, C, HW)
    if (not jnp.issubdtype(label.dtype, jnp.integer)
            or jnp.dtype(label.dtype).itemsize > 4):
        label = label.astype(jnp.int32)      # defensive; int8/16/32 pass through
    lab = label.reshape(N, 1, HW)

    pred_isz = jnp.dtype(pred.dtype).itemsize
    lab_isz = jnp.dtype(lab.dtype).itemsize

    # Generation-aware VMEM budget: scoped limit at half of physical per-core
    # VMEM (64 MiB on 128-MiB parts, 32 MiB on v7x), requested explicitly, and
    # blocks sized against ~75% of the limit (headroom for compiler scratch).
    vmem_cap = _vmem_capacity_bytes()
    vmem_limit = int(min(max(vmem_cap // 2, 16 * 1024 * 1024), 64 * 1024 * 1024))
    budget = (vmem_limit * 3) // 4

    class_chunk = 16 if pred_isz <= 2 else 8       # sublane-packed chunk rows
    cc_eff = min(class_chunk, C)
    bytes_per_px = (2 * C * pred_isz               # double-buffered logit blocks
                    + 2 * lab_isz                  # double-buffered label blocks
                    + 6 * cc_eff * 4               # chunk-sized f32 temporaries
                    + 10 * 4)                      # (1, T) f32 vectors
    max_px = max(128, (budget // bytes_per_px) // 128 * 128)
    tile = min(int(tile_px), max_px)

    if HW <= tile:
        t = HW                                     # full-extent block, always legal
        num_tiles = 1
    else:
        t = max(128, (tile // 128) * 128)          # lane-aligned tile
        num_tiles = pl.cdiv(HW, t)
    ragged = (HW % t) != 0                         # only the last tile is partial

    kernel = functools.partial(
        _ce_kernel, ignore_index=int(ignore_index), hw=HW, tile_px=t,
        class_chunk=class_chunk, ragged=ragged)

    partials = pl.pallas_call(
        kernel,
        out_shape=jax.ShapeDtypeStruct((N, num_tiles, 1, 1), jnp.float32),
        grid_spec=pltpu.PrefetchScalarGridSpec(
            num_scalar_prefetch=0,
            grid=(N, num_tiles),
            in_specs=[
                pl.BlockSpec((1, C, t), lambda n, j: (n, 0, j)),
                pl.BlockSpec((1, 1, t), lambda n, j: (n, 0, j)),
            ],
            out_specs=pl.BlockSpec((1, 1, 1, 1), lambda n, j: (n, j, 0, 0)),
        ),
        compiler_params=pltpu.CompilerParams(
            dimension_semantics=("parallel", "parallel"),
            vmem_limit_bytes=vmem_limit),
    )(pred, lab)

    # Mean over all N*H*W pixels (ignored pixels count in the denominator),
    # scaled by loss_weight -- matches weight_reduce_loss(reduction='mean').
    return jnp.sum(partials) * (float(loss_weight) / float(P))


def _reference_loss(cls_score, label, *, loss_weight=1.0, ignore_index=-100):
    """Pure-JAX reference matching F.cross_entropy(reduction='none').mean()."""
    logits = cls_score.astype(jnp.float32)                       # (N, C, H, W)
    lse = jax.scipy.special.logsumexp(logits, axis=1)            # (N, H, W)
    valid = label != ignore_index
    safe = jnp.where(valid, label, 0).astype(jnp.int32)
    picked = jnp.take_along_axis(logits, safe[:, None], axis=1)[:, 0]
    loss = jnp.where(valid, lse - picked, 0.0)
    return loss_weight * jnp.mean(loss)


if __name__ == "__main__":
    key = jax.random.PRNGKey(0)
    k = jax.random.split(key, 8)

    # Case 1: default small shapes (f32 logits, one full-extent tile/image).
    N, C, H, W = 2, 4, 16, 16
    cls_score = jax.random.normal(k[0], (N, C, H, W), dtype=jnp.float32)
    label = jax.random.randint(k[1], (N, H, W), 0, C, dtype=jnp.int32)
    label = jnp.where(jax.random.uniform(k[2], (N, H, W)) < 0.1,
                      jnp.int32(-100), label)
    loss = jax.block_until_ready(cross_entropy_loss(cls_score, label))
    ref = _reference_loss(cls_score, label)
    assert jnp.allclose(loss, ref, rtol=1e-5, atol=1e-5), (loss, ref)

    # Case 2: multi-tile path (two exact 128-px tiles; both grid axes parallel).
    loss2 = jax.block_until_ready(
        cross_entropy_loss(cls_score, label, tile_px=128))
    assert jnp.allclose(loss2, ref, rtol=1e-5, atol=1e-5), (loss2, ref)

    # Case 3: bf16 logits, ragged spatial extent -> partial last tile masked
    # in-kernel; bf16 max/gather path.
    N2, C2, H2, W2 = 2, 5, 10, 33
    cls2 = jax.random.normal(k[3], (N2, C2, H2, W2), dtype=jnp.bfloat16)
    lab2 = jax.random.randint(k[4], (N2, H2, W2), 0, C2, dtype=jnp.int32)
    loss3 = jax.block_until_ready(
        cross_entropy_loss(cls2, lab2, loss_weight=0.5, tile_px=128))
    ref3 = _reference_loss(cls2, lab2, loss_weight=0.5)
    assert jnp.allclose(loss3, ref3, rtol=1e-4, atol=1e-4), (loss3, ref3)

    # Case 4: C=19 (Cityscapes-like), N=1: exercises the multi-chunk class loop
    # (two full 8-row chunks + a 3-row tail), a ragged pixel tile, and the
    # tile-axis parallelism path.
    N3, C3, H3, W3 = 1, 19, 9, 15
    cls3 = jax.random.normal(k[5], (N3, C3, H3, W3), dtype=jnp.float32)
    lab3 = jax.random.randint(k[6], (N3, H3, W3), 0, C3, dtype=jnp.int32)
    lab3 = jnp.where(jax.random.uniform(k[7], (N3, H3, W3)) < 0.15,
                     jnp.int32(-100), lab3)
    loss4 = jax.block_until_ready(cross_entropy_loss(cls3, lab3, tile_px=128))
    ref4 = _reference_loss(cls3, lab3)
    assert jnp.allclose(loss4, ref4, rtol=1e-5, atol=1e-5), (loss4, ref4)

    # TODO(synk): use_sigmoid / use_mask / is_domain_loss branches and the
    # per-sample `weight` / `avg_factor` / class_weight / reduction_override
    # arguments are not exercised by the default module config and are not
    # implemented here.
    print("KERNEL_OK")
</pallas_src>

<mosaic_0001>
module attributes {stable_mosaic.version = 11 : i64} {
  func.func @_ce_kernel(%arg0: i32, %arg1: i32, %arg2: memref<1x4x256xf32, #tpu.memory_space<vmem>>, %arg3: memref<1x1x256xi32, #tpu.memory_space<vmem>>, %arg4: memref<1x1x1x1xf32, #tpu.memory_space<vmem>>) attributes {dimension_semantics = [#tpu.dimension_semantics<parallel>, #tpu.dimension_semantics<parallel>], iteration_bounds = array<i64: 2, 1>, scalar_prefetch = 0 : i64, scratch_operands = 0 : i64, tpu.core_type = #tpu.core_type<tc>, window_params = [{transform_indices = @transform_0, window_bounds = array<i64: 1, 4, 256>}, {transform_indices = @transform_1, window_bounds = array<i64: 1, 1, 256>}, {transform_indices = @transform_2, window_bounds = array<i64: 1, 1, 1, 1>}]} {
    %c0 = arith.constant 0 : index
    %c0_0 = arith.constant 0 : index
    %c0_1 = arith.constant 0 : index
    %0 = vector.load %arg3[%c0, %c0_0, %c0_1] : memref<1x1x256xi32, #tpu.memory_space<vmem>>, vector<1x1x256xi32>
    %1 = vector.shape_cast %0 : vector<1x1x256xi32> to vector<1x256xi32>
    %c0_2 = arith.constant 0 : index
    %c0_3 = arith.constant 0 : index
    %c0_4 = arith.constant 0 : index
    %2 = vector.load %arg2[%c0_2, %c0_3, %c0_4] : memref<1x4x256xf32, #tpu.memory_space<vmem>>, vector<1x4x256xf32>
    %3 = vector.shape_cast %2 : vector<1x4x256xf32> to vector<4x256xf32>
    %cst = arith.constant dense<0xFF800000> : vector<256xf32>
    %4 = vector.multi_reduction <maximumf>, %3, %cst [0] : vector<4x256xf32> to vector<256xf32>
    %5 = vector.shape_cast %4 : vector<256xf32> to vector<1x256xf32>
    %cst_5 = arith.constant 0.000000e+00 : f32
    %6 = vector.broadcast %cst_5 : f32 to vector<1x256xf32>
    %cst_6 = arith.constant 0.000000e+00 : f32
    %7 = vector.broadcast %cst_6 : f32 to vector<1x256xf32>
    %c0_7 = arith.constant 0 : index
    %c0_8 = arith.constant 0 : index
    %c0_9 = arith.constant 0 : index
    %8 = vector.load %arg2[%c0_7, %c0_8, %c0_9] : memref<1x4x256xf32, #tpu.memory_space<vmem>>, vector<1x4x256xf32>
    %9 = vector.shape_cast %8 : vector<1x4x256xf32> to vector<4x256xf32>
    %10 = tpu.iota {dimensions = array<i32: 0>} : vector<4x256xi32>
    %c0_i32 = arith.constant 0 : i32
    %11 = vector.broadcast %c0_i32 : i32 to vector<4x256xi32>
    %12 = arith.addi %11, %10 : vector<4x256xi32>
    %13 = vector.broadcast %1 : vector<1x256xi32> to vector<4x256xi32>
    %14 = arith.cmpi eq, %12, %13 : vector<4x256xi32>
    %cst_10 = arith.constant 0.000000e+00 : f32
    %15 = vector.broadcast %cst_10 : f32 to vector<4x256xf32>
    %16 = arith.select %14, %9, %15 : vector<4x256xi1>, vector<4x256xf32>
    %cst_11 = arith.constant dense<0.000000e+00> : vector<256xf32>
    %17 = vector.multi_reduction <add>, %16, %cst_11 [0] : vector<4x256xf32> to vector<256xf32>
    %18 = vector.shape_cast %17 : vector<256xf32> to vector<1x256xf32>
    %19 = arith.addf %7, %18 : vector<1x256xf32>
    %20 = vector.broadcast %5 : vector<1x256xf32> to vector<4x256xf32>
    %21 = arith.subf %9, %20 : vector<4x256xf32>
    %22 = math.exp %21 : vector<4x256xf32>
    %cst_12 = arith.constant dense<0.000000e+00> : vector<256xf32>
    %23 = vector.multi_reduction <add>, %22, %cst_12 [0] : vector<4x256xf32> to vector<256xf32>
    %24 = vector.shape_cast %23 : vector<256xf32> to vector<1x256xf32>
    %25 = arith.addf %6, %24 : vector<1x256xf32>
    %26 = math.log %25 : vector<1x256xf32>
    %27 = arith.subf %5, %19 : vector<1x256xf32>
    %28 = arith.addf %26, %27 : vector<1x256xf32>
    %c-100_i32 = arith.constant -100 : i32
    %29 = vector.broadcast %c-100_i32 : i32 to vector<1x256xi32>
    %30 = arith.cmpi ne, %1, %29 : vector<1x256xi32>
    %cst_13 = arith.constant 0.000000e+00 : f32
    %31 = vector.broadcast %cst_13 : f32 to vector<1x256xf32>
    %32 = arith.select %30, %28, %31 : vector<1x256xi1>, vector<1x256xf32>
    %cst_14 = arith.constant dense<0.000000e+00> : vector<1xf32>
    %33 = vector.multi_reduction <add>, %32, %cst_14 [1] : vector<1x256xf32> to vector<1xf32>
    %34 = vector.shape_cast %33 : vector<1xf32> to vector<1x1xf32>
    %35 = vector.shape_cast %34 : vector<1x1xf32> to vector<1x1x1x1xf32>
    %c0_15 = arith.constant 0 : index
    %c0_16 = arith.constant 0 : index
    %c0_17 = arith.constant 0 : index
    %c0_18 = arith.constant 0 : index
    %36 = vector.load %arg4[%c0_15, %c0_16, %c0_17, %c0_18] : memref<1x1x1x1xf32, #tpu.memory_space<vmem>>, vector<1x1x1x1xf32>
    tpu.vector_store %arg4[%c0_15, %c0_16, %c0_17, %c0_18], %35 {strides = array<i32>} : memref<1x1x1x1xf32, #tpu.memory_space<vmem>>, vector<1x1x1x1xf32>,
    return
  }
  func.func @transform_0(%arg0: i32, %arg1: i32) -> (i32, i32, i32) {
    %c0_i32 = arith.constant 0 : i32
    %c0_i32_0 = arith.constant 0 : i32
    return %arg0, %c0_i32, %arg1 : i32, i32, i32
  }
  func.func @transform_1(%arg0: i32, %arg1: i32) -> (i32, i32, i32) {
    %c0_i32 = arith.constant 0 : i32
    %c0_i32_0 = arith.constant 0 : i32
    return %arg0, %c0_i32, %arg1 : i32, i32, i32
  }
  func.func @transform_2(%arg0: i32, %arg1: i32) -> (i32, i32, i32, i32) {
    %c0_i32 = arith.constant 0 : i32
    %c0_i32_0 = arith.constant 0 : i32
    %c0_i32_1 = arith.constant 0 : i32
    return %arg0, %arg1, %c0_i32, %c0_i32_0 : i32, i32, i32, i32
  }
}

</mosaic_0001>

<bundles_post_ra>
// kernel: tpu_custom_call.1
= control target key start
LH: loop header
LB: loop body
LE: loop exit
PB: predicated region body
PF: predicated region fallthrough
CT: control target
= control target key end

     0   :  { %7 = vsyncpa [#allocation3], 0  ;;  %s767_s0 = inlined_call_operand.hbm [shape: f32[2,4,256], index: 0, kind: input, shape index: {}]   ;;  %s768_s1 = inlined_call_operand.hbm [shape: s32[2,1,256], index: 1, kind: input, shape index: {}]   ;;  %s769_s2 = inlined_call_operand.vmem [shape: f32[2,1,1,1], index: 2, kind: output, shape index: {}]  }
   0x1   :  { %9 = vsyncpa [#allocation3 + $0x1], 0 }
   0x2   :  { %10 = vsyncpa [#allocation5], 0 }
   0x3   :  { %12 = vsyncpa [#allocation5 + $0x1], 0  ;;  %s656_s9 = smov 0   ;;  %s658_s10 = smov 0  }
   0x4   :  { %s660_s11 = smov 0   ;;  %s662_s12 = smov 0  }
   0x5   :  { %s664_s13 = smov 0   ;;  %s666_s14 = smov 0  }
   0x6 LB: > { %s444_s15 = sadd.s32 4294967295, %s639_s14   ;;  %s30_s16 = sadd.s32 1, %s635_s13  ;;  %s639_s14 = sphi %s666_s14, %s18_s14   ;;  %s635_s13 = sphi %s664_s13, %s777_s13   ;;  %s631_s12 = sphi %s662_s12, %s776_s12   ;;  %s627_s11 = sphi %s660_s11, %s775_s11   ;;  %s623_s10 = sphi %s658_s10, %s774_s10   ;;  %s619_s9 = sphi %s656_s9, %s773_s9  }
   0x7   : > { %p32_p0 = scmp.ge.s32.totalorder %s30_s16, 2  ;;  %s39_s17 = sadd.s32 1, %s627_s11 }
   0x8   : > { %p46_p1 = scmp.ne.s32.totalorder %s627_s11, %s623_s10  ;;  %p47_p2 = scmp.eq.s32.totalorder %s639_s14, 0 }
   0x9   : > { %s779_s16 = smov (%p32_p0, %s30_s16), 0  ;;  %p52_p4 = scmp.ne.s32.totalorder %s623_s10, %s619_s9 }
   0xa   : > { %p692_p3 = por %p47_p2, %p46_p1  ;;  %s34_s19 = ssub.s32 %s635_s13, %s779_s16 }
   0xb   : > { %p53_p5 = scmp.eq.s32.totalorder %s444_s15, 0  ;;  %p37_p6 = scmp.eq.s32.totalorder %s34_s19, 0 }
   0xc   : > { %p470_p8 = scmp.lt.s32.totalorder %s639_s14, 2  ;;  %s132_s22 = sand.u32 1, %s627_s11  }
   0xd   : > { %p699_p7 = por %p53_p5, %p52_p4  ;;  %s458_s23 = sshll.u32 %s635_s13, 3 }
   0xe   : > { %s705_s21 = scalar_select %p37_p6, %s627_s11, %s39_s17  }
   0xf   : > { %s448_s24 = sshll.u32 %s132_s22, 3  ;;  %s143_s27 = scalar_lea.hbm %s767_s0, %s458_s23 }
  0x10   : > { %s145_s28 = sshll.u32 %s143_s27, 4  ;;  %s136_s29 = scalar_lea.vmem [#allocation2], %s448_s24  ;;  %s146_s28 = int_to_ptr.hbm [resolvable:$true] %s145_s28 }
  0x11   : > { %s147_s30 = sshll.u32 %s136_s29, 4  ;;  %p714_p9 = pnand %p470_p8, %p692_p3  ;;  %s148_s30 = int_to_ptr.vmem [resolvable:$true] %s147_s30 }
  0x12   : > { %p453_p10 = scmp.ge.s32.totalorder %s639_s14, 1  ;;  %p173_p11 = scmp.lt.s32.totalorder %s639_s14, 3 }
  0x13   : > { %s451_s4 = sshll.u32 %s132_s22, 1  ;;  %s133_s5 = scalar_lea.sflag [#allocation3], %s132_s22 }
  0x14   : > { %466 = dma.hbm_to_vmem [thread:$0]  (!%p714_p9), %s146_s28, 128, %s148_s30, %s133_s5  }
  0x15   : > { %p174_p12 = pnand %p453_p10, %p173_p11  ;;  %s452_s6 = sshll.u32 %s635_s13, 1 }
  0x16   : > { %s158_s7 = scalar_lea.vmem [#allocation4], %s451_s4  ;;  %s164_s17 = scalar_lea.hbm %s768_s1, %s452_s6 }
  0x17   : > { %s168_s8 = sshll.u32 %s158_s7, 4  ;;  %s166_s18 = sshll.u32 %s164_s17, 4  ;;  %s169_s8 = int_to_ptr.vmem [resolvable:$true] %s168_s8  ;;  %s167_s18 = int_to_ptr.hbm [resolvable:$true] %s166_s18 }
  0x18   : > { %s155_s19 = scalar_lea.sflag [#allocation5], %s132_s22  ;;  %177 = sbr.rel (%p174_p12) target bundleno = 228 (0xe4), region = 28 }
  0x19   : > { %469 = dma.hbm_to_vmem [thread:$0]  (!%p714_p9), %s167_s18, 32, %s169_s8, %s155_s19  }
  0x1a   : > { %s179_s23 = sand.u32 (!%p174_p12), 1, %s623_s10  }
  0x1b   : > { %s454_s24 = sshll.u32 (!%p174_p12), %s179_s23, 3  ;;  %s180_s25 = scalar_lea.sflag (!%p174_p12), [#allocation3], %s179_s23 }
  0x1c   : > { %s183_s26 = scalar_lea.vmem (!%p174_p12), [#allocation2], %s454_s24 }
  0x1d   : > { %610 = dma.done.wait (%p699_p7), %s180_s25, 128  }
  0x1e   : > { %612 = vsyncadd (%p699_p7), %s180_s25, 4294967168  ;;  %s455_s27 = sshll.u32 %s179_s23, 1  ;;  %s190_s28 = scalar_lea.sflag [#allocation5], %s179_s23 }
  0x1f   : > { %s193_s29 = scalar_lea.vmem [#allocation4], %s455_s27 }
  0x20   : > { %614 = dma.done.wait (%p699_p7), %s190_s28, 32  }
  0x21   : > { %616 = vsyncadd (%p699_p7), %s190_s28, 4294967264  ;;  %v230_v0 = vld [vmem:[%s183_s26] sm:$0xff]  ;;  %vm237_vm0 = vcmask 1043456   ;;  %v252_v17 = vlaneseq  ;;  %v229_v19 = vld [vmem:[%s193_s29] sm:$0x3]  ;;  %vm323_vm3 = vcmask 1040384  }
  0x22   : > { %232 = vst [vmem:[#allocation1] ss:$2 sm:$0xff] %v230_v0  ;;  %v254_v23 = vperm.slane %v229_v19, 0  ;;  %v255_v24 = vperm.slane %v229_v19, 1  ;;  %vm319_vm4 = vcmp.ne.s32.totalorder %v229_v19, 4294967196  ;;  %p223_p13 = scmp.lt.s32.totalorder %s631_s12, 1 }
  0x23   : > { %v253_v22 = vshrl.u32 %v252_v17, 7  ;;  %vm337_vm5 = vcmask 0  }
  0x24   : > { %s781_s12 = smov (!%p223_p13, %s631_s12), 1 }
  0x25   : > { %vm256_vm1 = vcmp.eq.s32.totalorder %v253_v22, %v254_v23  ;;  %vm257_vm2 = vcmp.eq.s32.totalorder %v253_v22, %v255_v24  ;;  %s228_s30 = scalar_lea.vmem %s769_s2, %s781_s12 }
  0x29   : > { %v233_v1 = vld.sshfl [vmem:[#allocation1] sm:$0xff pattern:$0x75316420]  ;;  %v234_v2 = vld.sshfl [vmem:[#allocation1 + $0x8] sm:$0xff pattern:$0x75316420] }
  0x2a   : > { %v238_v3 = vsel %vm237_vm0, %v233_v1, -inf  ;;  %v245_v4 = vsel %vm237_vm0, %v234_v2, -inf  ;;  %258 = vst [vmem:[#allocation1] ss:$2 sm:$0xff] %v230_v0 }
  0x2b   : > { %v239_v5 = vrot.slane %v238_v3, 4  ;;  %v246_v6 = vrot.slane %v245_v4, 4 }
  0x2d   : > { %v240_v7 = vmax.f32 %v238_v3, %v239_v5  ;;  %v247_v8 = vmax.f32 %v245_v4, %v246_v6 }
  0x2f   : > { %v241_v9 = vrot.slane %v240_v7, 2  ;;  %v248_v10 = vrot.slane %v247_v8, 2 }
  0x31   : > { %v242_v11 = vmax.f32 %v240_v7, %v241_v9  ;;  %v249_v12 = vmax.f32 %v247_v8, %v248_v10  ;;  %v259_v26 = vld.sshfl [vmem:[#allocation1] sm:$0xff pattern:$0x75316420]  ;;  %v260_v27 = vld.sshfl [vmem:[#allocation1 + $0x8] sm:$0xff pattern:$0x75316420] }
  0x32   : > { %v263_v28 = vsel %vm256_vm1, %v259_v26, 0.0  ;;  %v264_v29 = vsel %vm257_vm2, %v260_v27, 0.0 }
  0x33   : > { %v243_v13 = vrot.slane %v242_v11, 1  ;;  %v250_v14 = vrot.slane %v249_v12, 1  ;;  %v265_v31 = vsel %vm237_vm0, %v263_v28, 0.0  ;;  %v272_v32 = vsel %vm237_vm0, %v264_v29, 0.0 }
  0x34   : > { %v266_v33 = vrot.slane %v265_v31, 4  ;;  %v273_v34 = vrot.slane %v272_v32, 4 }
  0x35   : > { %v244_v15 = vmax.f32 %v242_v11, %v243_v13  ;;  %v251_v16 = vmax.f32 %v249_v12, %v250_v14 }
  0x36   : > { %v267_v35 = vadd.f32 %v266_v33, %v265_v31  ;;  %v274_v36 = vadd.f32 %v273_v34, %v272_v32 }
  0x37   : > { %v283_v18 = vrot.slane %v251_v16, 4 }
  0x38   : > { %v268_v43 = vrot.slane %v267_v35, 2  ;;  %v275_v44 = vrot.slane %v274_v36, 2 }
  0x39   : > { %v284_v20 = vsel %vm237_vm0, %v244_v15, %v283_v18 }
  0x3a   : > { %v286_v21 = vsub.f32 %v230_v0, %v284_v20  ;;  %v269_v49 = vadd.f32 %v268_v43, %v267_v35  ;;  %v276_v50 = vadd.f32 %v275_v44, %v274_v36 }
  0x3c   : > { %v287_v25 = vmul.f32 1.442695, %v286_v21  ;;  %v270_v55 = vrot.slane %v269_v49, 1  ;;  %v277_v56 = vrot.slane %v276_v50, 1 }
  0x3e   : > { %519 = vpow2.f32 %v287_v25  ;;  %v271_v59 = vadd.f32 %v270_v55, %v269_v49  ;;  %v278_v60 = vadd.f32 %v277_v56, %v276_v50 }
  0x40   : > { %v315_v62 = vsub.f32 %v244_v15, %v271_v59  ;;  %v316_v63 = vsub.f32 %v251_v16, %v278_v60 }
  0x44   : > { %v520_v30 = vpop.eup %519 }
  0x45   : > { %290 = vst [vmem:[#allocation1] ss:$2 sm:$0xff] %v520_v30 }
  0x4c   : > { %v291_v37 = vld.sshfl [vmem:[#allocation1] sm:$0xff pattern:$0x75316420]  ;;  %v292_v38 = vld.sshfl [vmem:[#allocation1 + $0x8] sm:$0xff pattern:$0x75316420] }
  0x4d   : > { %v295_v39 = vsel %vm237_vm0, %v291_v37, 0.0  ;;  %v302_v40 = vsel %vm237_vm0, %v292_v38, 0.0 }
  0x4e   : > { %v296_v41 = vrot.slane %v295_v39, 4  ;;  %v303_v42 = vrot.slane %v302_v40, 4 }
  0x50   : > { %v297_v45 = vadd.f32 %v296_v41, %v295_v39  ;;  %v304_v46 = vadd.f32 %v303_v42, %v302_v40 }
  0x52   : > { %v298_v47 = vrot.slane %v297_v45, 2  ;;  %v305_v48 = vrot.slane %v304_v46, 2 }
  0x54   : > { %v299_v51 = vadd.f32 %v298_v47, %v297_v45  ;;  %v306_v52 = vadd.f32 %v305_v48, %v304_v46 }
  0x56   : > { %v300_v53 = vrot.slane %v299_v51, 1  ;;  %v307_v54 = vrot.slane %v306_v52, 1 }
  0x58   : > { %v301_v57 = vadd.f32 %v300_v53, %v299_v51  ;;  %v308_v58 = vadd.f32 %v307_v54, %v306_v52 }
  0x5a   : > { %521 = vlog2.f32 %v301_v57 }
  0x5b   : > { %523 = vlog2.f32 %v308_v58 }
  0x60   : > { %v522_v61 = vpop.eup %521 }
  0x61   : > { %v524_v0 = vpop.eup %523  ;;  %v312_v1 = vmul.f32 0.6931472, %v522_v61 }
  0x62   : > { %v314_v2 = vmul.f32 0.6931472, %v524_v0 }
  0x63   : > { %v317_v3 = vadd.f32 %v315_v62, %v312_v1 }
  0x64   : > { %v318_v4 = vadd.f32 %v316_v63, %v314_v2 }
  0x66   : > { %v322_v5 = vrot.slane %v318_v4, 7 }
  0x68   : > { %v324_v6 = vsel %vm323_vm3, %v317_v3, %v322_v5 }
  0x69   : > { %v326_v7 = vsel %vm319_vm4, %v324_v6, 0.0 }
  0x6a   : > { %v328_v8 = vperm.slane %v326_v7, 0  ;;  %v329_v9 = vperm.slane %v326_v7, 1 }
  0x6c   : > { %v332_v10 = vsel %vm323_vm3, %v328_v8, 0.0  ;;  %v333_v11 = vsel %vm323_vm3, %v329_v9, 0.0 }
  0x6d   : > { %v334_v12 = vadd.f32 %v333_v11, %v332_v10 }
  0x6f   : > { %335 = vadd.xlane.f32.xlu0 %v334_v12 }
  0xe2   : > { %v336_v13 = vpop.xlane.xlu0 %335 }
  0xe3   : > { %338 = vst.msk [vmem:[%s228_s30] sm:$0x1] %vm337_vm5, %v336_v13 }
  0xe4 PF: > { %s18_s14 = sadd.s32 1, %s639_s14   ;;  %s773_s9 = smov %s623_s10 }
  0xe5   : > { %p15_p0 = scmp.ge.s32.totalorder %s18_s14, 4   ;;  %s774_s10 = smov %s627_s11 }
  0xe6   : > { %s775_s11 = smov %s705_s21  ;;  %s776_s12 = smov %s635_s13 }
  0xe7   : > { %s777_s13 = smov %s779_s16  ;;  %17 = sbr.rel (!%p15_p0) target bundleno = 6 (0x6), region = 81 }
  0xec   :  { %362 = vsyncpa [#allocation3], 1 }
  0xed   :  { %364 = vsyncpa [#allocation3 + $0x1], 1 }
  0xee   :  { %365 = vsyncpa [#allocation5], 1 }
  0xef   :  { %367 = vsyncpa [#allocation5 + $0x1], 1 }

</bundles_post_ra>
